<compile_context>
chip_gen: v5e
topology: v5e:2x2
jax: 0.10.0
libtpu: 0.0.40
codegen_flags: <defaults>
</compile_context>

<pallas_src>
import functools
import math

import jax
import jax.numpy as jnp
from jax.experimental import pallas as pl
from jax.experimental.pallas import tpu as pltpu


def _pick_batch_tile(B):
    """Largest divisor of B that is 256-, 128-, or 8-aligned (in that preference)."""
    for align, cap in ((256, 512), (128, 256), (8, 256)):
        best = 0
        m = align
        while m <= min(B, cap):
            if B % m == 0:
                best = m
            m += align
        if best:
            return best
    return B


def _pick_col_tile(N, H, block_batch, vocab_size, w_bytes, out_bytes):
    """Largest divisor of N that is a multiple of lcm(256|128, vocab) within a VMEM budget."""
    if N <= 512:
        return N
    # ~12 MiB for double-buffered W tile + output tile + bias: safe on v7x's 64 MiB VMEM.
    budget = 12 * 1024 * 1024
    per_col = 2 * (H * w_bytes + block_batch * out_bytes + 4)
    cap = min(max(128, budget // per_col), 8192)
    for base in (256, 128):     # 256-multiples fill v6e/v7x 256x256 MXUs; 128 for v5e
        align = math.lcm(base, vocab_size)
        best = 0
        m = align
        while m <= min(N, cap):
            if N % m == 0:
                best = m
            m += align
        if best:
            return best
    return N


def _gumbel_wrapper_kernel(t_ref, seed_ref, x_ref, w_ref, b_ref, o_ref, *,
                           vocab_size, hard, total_cols, block_batch, block_cols,
                           cols_outer):
    """One (col-tile, batch-tile) grid step.

    t_ref    : (1,)  f32  SMEM   temperature
    seed_ref : (1,)  i32  SMEM   base PRNG seed
    x_ref    : (TB, H)    VMEM   (bf16 if mxu_bf16)
    w_ref    : (H, TN)    VMEM   (bf16 if mxu_bf16; TN is a multiple of vocab_size)
    b_ref    : (1, TN)    VMEM   f32
    o_ref    : (TB, TN)   VMEM   lane-dense 2D output tile (single unmasked store)
    """
    if cols_outer:
        j = pl.program_id(0)   # column-tile index (outer)
        i = pl.program_id(1)   # batch-tile index (inner)
    else:
        i = pl.program_id(0)   # batch-tile index (outer)
        j = pl.program_id(1)   # column-tile index (inner)

    # ---- Linear layer on the MXU (operands pre-cast in the wrapper; f32 accumulation) ----
    logits = jnp.dot(x_ref[...], w_ref[...], preferred_element_type=jnp.float32)
    logits = logits + b_ref[...].astype(jnp.float32)
    tb, tn = logits.shape

    row_l = jax.lax.broadcasted_iota(jnp.int32, (tb, tn), 0)
    col_l = jax.lax.broadcasted_iota(jnp.int32, (tb, tn), 1)

    # ---- Gumbel noise via a counter-based hash PRNG (pure jnp ops only; pltpu.prng_* has
    #      no interpret-mode lowering).  Stream depends only on (global row, global col,
    #      seed), so it is independent of the tiling. ----
    # TODO(synk): RNG stream differs from torch.rand; the Gumbel(0,1) distribution matches.
    g_row = row_l + i * block_batch
    g_col = col_l + j * block_cols
    ctr = (g_row * total_cols + g_col).astype(jnp.uint32)
    h = ctr * jnp.uint32(0x9E3779B1) + seed_ref[0].astype(jnp.uint32) * jnp.uint32(0x85EBCA77)
    h = h ^ (h >> 16)
    h = h * jnp.uint32(0x7FEB352D)
    h = h ^ (h >> 15)
    h = h * jnp.uint32(0x846CA68B)
    h = h ^ (h >> 16)
    u = (h >> 8).astype(jnp.int32).astype(jnp.float32) * jnp.float32(1.0 / (1 << 24))
    eps = jnp.float32(1e-20)
    g = -jnp.log(-jnp.log(u + eps) + eps)

    y = logits + g                           # (TB, TN) f32 epilogue math

    pos = col_l % vocab_size                 # position of each lane within its vocab group

    # ---- Per-group max broadcast to every lane: full-width rolls + masks (XLU work),
    #      no narrow slices, no reshape to a vocab-wide last dim. ----
    m = y
    for d in range(1, vocab_size):
        fwd = jnp.roll(y, -d, axis=-1)               # member at +d (valid if still in group)
        bwd = jnp.roll(y, vocab_size - d, axis=-1)   # wrapped member at -(vocab-d)
        m = jnp.maximum(m, jnp.where(pos < vocab_size - d, fwd, bwd))

    if hard:
        # One-hot of the per-group argmax (earliest max wins, like torch .max()).
        # argmax(softmax(y/T)) == argmax(y): scale/exp/sum/divide skipped entirely.
        eq = (y == m).astype(jnp.float32)
        win = eq
        for d in range(1, vocab_size):
            prev = jnp.roll(eq, d, axis=-1)          # earlier group member at -d
            win = win * jnp.where(pos >= d, 1.0 - prev, 1.0)
        o_ref[...] = win.astype(o_ref.dtype)
        # TODO(synk): straight-through gradient (y_hard - y.detach() + y) needs a
        # custom_vjp around this forward-only kernel.
    else:
        inv_t = 1.0 / t_ref[0]
        e = jnp.exp((y - m) * inv_t)                 # stable softmax of y/T per group
        s = e
        for d in range(1, vocab_size):
            fwd = jnp.roll(e, -d, axis=-1)
            bwd = jnp.roll(e, vocab_size - d, axis=-1)
            s = s + jnp.where(pos < vocab_size - d, fwd, bwd)
        # Plain f32 divide: pl.reciprocal(approx=True) lacks an interpret-mode lowering.
        o_ref[...] = (e / s).astype(o_ref.dtype)


def gumbel_wrapper_forward(x, w, bias, temperature, seed, *,
                           max_len, vocab_size, straight_through=False,
                           block_batch=None, block_cols=None,
                           mxu_bf16=True, out_dtype=jnp.float32):
    """x: (B, H); w: (H, max_len*vocab_size) (pre-transposed Linear weight);
    bias: (1, max_len*vocab_size).  Returns (B, max_len, vocab_size) in out_dtype."""
    B, H = x.shape
    N = max_len * vocab_size
    assert w.shape == (H, N)
    assert bias.shape == (1, N)

    out_bytes = jnp.dtype(out_dtype).itemsize
    w_bytes = 2 if mxu_bf16 else 4

    if block_batch is None:
        block_batch = _pick_batch_tile(B)
    if block_cols is None:
        block_cols = _pick_col_tile(N, H, block_batch, vocab_size, w_bytes, out_bytes)

    assert B % block_batch == 0
    assert block_batch == B or block_batch % 8 == 0, "batch tile must be 8-aligned"
    assert N % block_cols == 0 and block_cols % vocab_size == 0
    assert block_cols == N or block_cols % 128 == 0, "column tile must be 128-aligned"

    if mxu_bf16:
        # Cast in the wrapper (not per grid step in the kernel): halves W's HBM->VMEM DMA
        # and its VMEM tile.  f32 accumulation is preserved via preferred_element_type.
        x_in = x.astype(jnp.bfloat16)
        w_in = w.astype(jnp.bfloat16)
    else:
        x_in, w_in = x, w

    # Re-stream the SMALLER operand across the outer grid axis:
    #   cols outer  -> W loaded once, x re-read once per column tile (good when B <= N)
    #   batch outer -> x loaded once, W re-read once per batch tile  (good when B  > N)
    cols_outer = (B <= N)
    n_col_tiles = N // block_cols
    n_bat_tiles = B // block_batch

    if cols_outer:
        grid = (n_col_tiles, n_bat_tiles)
        x_map = lambda j, i: (i, 0)
        w_map = lambda j, i: (0, j)
        b_map = lambda j, i: (0, j)
        o_map = lambda j, i: (i, j)
    else:
        grid = (n_bat_tiles, n_col_tiles)
        x_map = lambda i, j: (i, 0)
        w_map = lambda i, j: (0, j)
        b_map = lambda i, j: (0, j)
        o_map = lambda i, j: (i, j)

    t = jnp.asarray([temperature], dtype=jnp.float32)
    s = jnp.asarray([seed], dtype=jnp.int32)

    kernel = functools.partial(_gumbel_wrapper_kernel,
                               vocab_size=vocab_size,
                               hard=straight_through,
                               total_cols=N,
                               block_batch=block_batch,
                               block_cols=block_cols,
                               cols_outer=cols_outer)

    out2d = pl.pallas_call(
        kernel,
        out_shape=jax.ShapeDtypeStruct((B, N), out_dtype),
        grid=grid,
        in_specs=[
            pl.BlockSpec(memory_space=pltpu.MemorySpace.SMEM),      # temperature
            pl.BlockSpec(memory_space=pltpu.MemorySpace.SMEM),      # seed
            pl.BlockSpec((block_batch, H), x_map),                  # x
            pl.BlockSpec((H, block_cols), w_map),                   # w
            pl.BlockSpec((1, block_cols), b_map),                   # bias
        ],
        out_specs=pl.BlockSpec((block_batch, block_cols), o_map),
        compiler_params=pltpu.CompilerParams(
            # Outer axis "parallel": megacore (v7x) shards the larger operand's tiles
            # across TensorCores; inner axis "arbitrary" avoids duplicating it.
            dimension_semantics=("parallel", "arbitrary"),
            vmem_limit_bytes=32 * 1024 * 1024),                     # safe on v5e/v6e/v7x
    )(t, s, x_in, w_in, bias)

    # Lane-dense 2D store inside the kernel; the 3D view is produced here in the wrapper.
    return out2d.reshape(B, max_len, vocab_size)


if __name__ == "__main__":
    # Module hyperparameters (GumbelWrapper defaults except hidden_size, kept small).
    vocab_size = 3
    max_len = 2
    hidden_size = 32
    temperature = 1.0

    batch = 16                 # tiled as 2 batch tiles of 8 (exercises the grid)
    block_batch = 8

    key = jax.random.PRNGKey(0)
    kx, kw, kb = jax.random.split(key, 3)

    # Deterministic parameter init mimicking nn.Linear (uniform in +-1/sqrt(fan_in)).
    bound = 1.0 / (hidden_size ** 0.5)
    w = jax.random.uniform(kw, (hidden_size, max_len * vocab_size),
                           minval=-bound, maxval=bound, dtype=jnp.float32)
    bias = jax.random.uniform(kb, (1, max_len * vocab_size),
                              minval=-bound, maxval=bound, dtype=jnp.float32)
    x = jax.random.normal(kx, (batch, hidden_size), dtype=jnp.float32)

    # Soft path (straight_through=False, the module default).
    out = gumbel_wrapper_forward(x, w, bias, temperature, seed=1234,
                                 max_len=max_len, vocab_size=vocab_size,
                                 straight_through=False, block_batch=block_batch)
    out = jax.block_until_ready(out)
    assert out.shape == (batch, max_len, vocab_size)
    assert bool(jnp.all(jnp.isfinite(out)))
    assert bool(jnp.all((out >= 0.0) & (out <= 1.0)))
    assert jnp.allclose(jnp.sum(out, axis=-1), 1.0, atol=1e-4)   # softmax rows sum to 1

    # Hard (straight-through) forward path: exact one-hot rows.
    out_h = gumbel_wrapper_forward(x, w, bias, temperature, seed=1234,
                                   max_len=max_len, vocab_size=vocab_size,
                                   straight_through=True, block_batch=block_batch)
    out_h = jax.block_until_ready(out_h)
    assert out_h.shape == (batch, max_len, vocab_size)
    assert bool(jnp.all((out_h == 0.0) | (out_h == 1.0)))
    assert jnp.allclose(jnp.sum(out_h, axis=-1), 1.0)

    print("KERNEL_OK")
</pallas_src>

<mosaic_0001>
module attributes {stable_mosaic.version = 11 : i64} {
  func.func @_gumbel_wrapper_kernel(%arg0: i32, %arg1: i32, %arg2: memref<1xf32, #tpu.memory_space<smem>>, %arg3: memref<1xi32, #tpu.memory_space<smem>>, %arg4: memref<8x32xbf16, #tpu.memory_space<vmem>>, %arg5: memref<32x6xbf16, #tpu.memory_space<vmem>>, %arg6: memref<1x6xf32, #tpu.memory_space<vmem>>, %arg7: memref<8x6xf32, #tpu.memory_space<vmem>>) attributes {dimension_semantics = [#tpu.dimension_semantics<parallel>, #tpu.dimension_semantics<arbitrary>], iteration_bounds = array<i64: 2, 1>, scalar_prefetch = 0 : i64, scratch_operands = 0 : i64, tpu.core_type = #tpu.core_type<tc>, window_params = [{transform_indices = @transform_0, window_bounds = array<i64: 1>}, {transform_indices = @transform_1, window_bounds = array<i64: 1>}, {transform_indices = @transform_2, window_bounds = array<i64: 8, 32>}, {transform_indices = @transform_3, window_bounds = array<i64: 32, 6>}, {transform_indices = @transform_4, window_bounds = array<i64: 1, 6>}, {transform_indices = @transform_5, window_bounds = array<i64: 8, 6>}]} {
    %c0 = arith.constant 0 : index
    %c0_0 = arith.constant 0 : index
    %0 = vector.load %arg4[%c0, %c0_0] : memref<8x32xbf16, #tpu.memory_space<vmem>>, vector<8x32xbf16>
    %c0_1 = arith.constant 0 : index
    %c0_2 = arith.constant 0 : index
    %1 = vector.load %arg5[%c0_1, %c0_2] : memref<32x6xbf16, #tpu.memory_space<vmem>>, vector<32x6xbf16>
    %cst = arith.constant dense<0.000000e+00> : vector<8x6xf32>
    %2 = tpu.matmul %0, %1, %cst {dimension_numbers = #tpu.dot_dimension_numbers<[1], [0], [0], [1], [0, 0, 1, 1], [], []>} : vector<8x32xbf16>, vector<32x6xbf16>, vector<8x6xf32> -> vector<8x6xf32>
    %c0_3 = arith.constant 0 : index
    %c0_4 = arith.constant 0 : index
    %3 = vector.load %arg6[%c0_3, %c0_4] : memref<1x6xf32, #tpu.memory_space<vmem>>, vector<1x6xf32>
    %4 = vector.broadcast %3 : vector<1x6xf32> to vector<8x6xf32>
    %5 = arith.addf %2, %4 : vector<8x6xf32>
    %6 = tpu.iota {dimensions = array<i32: 0>} : vector<8x6xi32>
    %7 = tpu.iota {dimensions = array<i32: 1>} : vector<8x6xi32>
    %c8_i32 = arith.constant 8 : i32
    %8 = arith.muli %arg0, %c8_i32 : i32
    %9 = vector.broadcast %8 : i32 to vector<8x6xi32>
    %10 = arith.addi %6, %9 : vector<8x6xi32>
    %c6_i32 = arith.constant 6 : i32
    %11 = arith.muli %arg1, %c6_i32 : i32
    %12 = vector.broadcast %11 : i32 to vector<8x6xi32>
    %13 = arith.addi %7, %12 : vector<8x6xi32>
    %c6_i32_5 = arith.constant 6 : i32
    %14 = vector.broadcast %c6_i32_5 : i32 to vector<8x6xi32>
    %15 = arith.muli %10, %14 : vector<8x6xi32>
    %16 = arith.addi %15, %13 : vector<8x6xi32>
    %c-1640531535_i32 = arith.constant -1640531535 : i32
    %17 = vector.broadcast %c-1640531535_i32 : i32 to vector<8x6xi32>
    %18 = arith.muli %16, %17 : vector<8x6xi32>
    %c0_6 = arith.constant 0 : index
    %19 = memref.load %arg3[%c0_6] : memref<1xi32, #tpu.memory_space<smem>>
    %c-2048144777_i32 = arith.constant -2048144777 : i32
    %20 = arith.muli %19, %c-2048144777_i32 : i32
    %21 = vector.broadcast %20 : i32 to vector<8x6xi32>
    %22 = arith.addi %18, %21 : vector<8x6xi32>
    %c16_i32 = arith.constant 16 : i32
    %23 = vector.broadcast %c16_i32 : i32 to vector<8x6xi32>
    %24 = arith.shrui %22, %23 : vector<8x6xi32>
    %25 = arith.xori %22, %24 : vector<8x6xi32>
    %c2146121005_i32 = arith.constant 2146121005 : i32
    %26 = vector.broadcast %c2146121005_i32 : i32 to vector<8x6xi32>
    %27 = arith.muli %25, %26 : vector<8x6xi32>
    %c15_i32 = arith.constant 15 : i32
    %28 = vector.broadcast %c15_i32 : i32 to vector<8x6xi32>
    %29 = arith.shrui %27, %28 : vector<8x6xi32>
    %30 = arith.xori %27, %29 : vector<8x6xi32>
    %c-2073254261_i32 = arith.constant -2073254261 : i32
    %31 = vector.broadcast %c-2073254261_i32 : i32 to vector<8x6xi32>
    %32 = arith.muli %30, %31 : vector<8x6xi32>
    %c16_i32_7 = arith.constant 16 : i32
    %33 = vector.broadcast %c16_i32_7 : i32 to vector<8x6xi32>
    %34 = arith.shrui %32, %33 : vector<8x6xi32>
    %35 = arith.xori %32, %34 : vector<8x6xi32>
    %c8_i32_8 = arith.constant 8 : i32
    %36 = vector.broadcast %c8_i32_8 : i32 to vector<8x6xi32>
    %37 = arith.shrui %35, %36 : vector<8x6xi32>
    %38 = arith.sitofp %37 : vector<8x6xi32> to vector<8x6xf32>
    %cst_9 = arith.constant 5.96046448E-8 : f32
    %39 = vector.broadcast %cst_9 : f32 to vector<8x6xf32>
    %40 = arith.mulf %38, %39 : vector<8x6xf32>
    %cst_10 = arith.constant 9.99999968E-21 : f32
    %41 = vector.broadcast %cst_10 : f32 to vector<8x6xf32>
    %42 = arith.addf %40, %41 : vector<8x6xf32>
    %43 = math.log %42 : vector<8x6xf32>
    %cst_11 = arith.constant 0.000000e+00 : f32
    %44 = vector.broadcast %cst_11 : f32 to vector<8x6xf32>
    %45 = arith.subf %44, %43 : vector<8x6xf32>
    %cst_12 = arith.constant 9.99999968E-21 : f32
    %46 = vector.broadcast %cst_12 : f32 to vector<8x6xf32>
    %47 = arith.addf %45, %46 : vector<8x6xf32>
    %48 = math.log %47 : vector<8x6xf32>
    %cst_13 = arith.constant 0.000000e+00 : f32
    %49 = vector.broadcast %cst_13 : f32 to vector<8x6xf32>
    %50 = arith.subf %49, %48 : vector<8x6xf32>
    %51 = arith.addf %5, %50 : vector<8x6xf32>
    %c3_i32 = arith.constant 3 : i32
    %c0_i32 = arith.constant 0 : i32
    %52 = arith.cmpi eq, %c3_i32, %c0_i32 : i32
    %c1_i32 = arith.constant 1 : i32
    %53 = arith.select %52, %c1_i32, %c3_i32 : i32
    %54 = vector.broadcast %53 : i32 to vector<8x6xi32>
    %55 = arith.remsi %7, %54 : vector<8x6xi32>
    %c0_i32_14 = arith.constant 0 : i32
    %56 = vector.broadcast %c0_i32_14 : i32 to vector<8x6xi32>
    %57 = arith.cmpi ne, %55, %56 : vector<8x6xi32>
    %c0_i32_15 = arith.constant 0 : i32
    %58 = vector.broadcast %c0_i32_15 : i32 to vector<8x6xi32>
    %59 = arith.cmpi slt, %55, %58 : vector<8x6xi32>
    %c0_i32_16 = arith.constant 0 : i32
    %60 = arith.cmpi slt, %53, %c0_i32_16 : i32
    %61 = vector.broadcast %60 : i1 to vector<8x6xi1>
    %62 = vector.broadcast %61 : vector<8x6xi1> to vector<8x6xi1>
    %63 = arith.xori %59, %62 : vector<8x6xi1>
    %64 = arith.andi %63, %57 : vector<8x6xi1>
    %65 = vector.broadcast %53 : i32 to vector<8x6xi32>
    %66 = arith.addi %55, %65 : vector<8x6xi32>
    %67 = arith.select %64, %66, %55 : vector<8x6xi1>, vector<8x6xi32>
    %68 = vector.extract_strided_slice %51 {offsets = [0, 1], sizes = [8, 5], strides = [1, 1]} : vector<8x6xf32> to vector<8x5xf32>
    %69 = vector.extract_strided_slice %51 {offsets = [0, 0], sizes = [8, 1], strides = [1, 1]} : vector<8x6xf32> to vector<8x1xf32>
    %70 = tpu.concatenate %68, %69 in 1 : vector<8x5xf32>, vector<8x1xf32> -> vector<8x6xf32>
    %71 = vector.extract_strided_slice %51 {offsets = [0, 4], sizes = [8, 2], strides = [1, 1]} : vector<8x6xf32> to vector<8x2xf32>
    %72 = vector.extract_strided_slice %51 {offsets = [0, 0], sizes = [8, 4], strides = [1, 1]} : vector<8x6xf32> to vector<8x4xf32>
    %73 = tpu.concatenate %71, %72 in 1 : vector<8x2xf32>, vector<8x4xf32> -> vector<8x6xf32>
    %c2_i32 = arith.constant 2 : i32
    %74 = vector.broadcast %c2_i32 : i32 to vector<8x6xi32>
    %75 = arith.cmpi slt, %67, %74 : vector<8x6xi32>
    %76 = arith.select %75, %70, %73 : vector<8x6xi1>, vector<8x6xf32>
    %77 = arith.maximumf %51, %76 : vector<8x6xf32>
    %78 = vector.extract_strided_slice %51 {offsets = [0, 2], sizes = [8, 4], strides = [1, 1]} : vector<8x6xf32> to vector<8x4xf32>
    %79 = vector.extract_strided_slice %51 {offsets = [0, 0], sizes = [8, 2], strides = [1, 1]} : vector<8x6xf32> to vector<8x2xf32>
    %80 = tpu.concatenate %78, %79 in 1 : vector<8x4xf32>, vector<8x2xf32> -> vector<8x6xf32>
    %81 = vector.extract_strided_slice %51 {offsets = [0, 5], sizes = [8, 1], strides = [1, 1]} : vector<8x6xf32> to vector<8x1xf32>
    %82 = vector.extract_strided_slice %51 {offsets = [0, 0], sizes = [8, 5], strides = [1, 1]} : vector<8x6xf32> to vector<8x5xf32>
    %83 = tpu.concatenate %81, %82 in 1 : vector<8x1xf32>, vector<8x5xf32> -> vector<8x6xf32>
    %c1_i32_17 = arith.constant 1 : i32
    %84 = vector.broadcast %c1_i32_17 : i32 to vector<8x6xi32>
    %85 = arith.cmpi slt, %67, %84 : vector<8x6xi32>
    %86 = arith.select %85, %80, %83 : vector<8x6xi1>, vector<8x6xf32>
    %87 = arith.maximumf %77, %86 : vector<8x6xf32>
    %c0_18 = arith.constant 0 : index
    %88 = memref.load %arg2[%c0_18] : memref<1xf32, #tpu.memory_space<smem>>
    %cst_19 = arith.constant 1.000000e+00 : f32
    %89 = arith.divf %cst_19, %88 : f32
    %90 = arith.subf %51, %87 : vector<8x6xf32>
    %91 = vector.broadcast %89 : f32 to vector<8x6xf32>
    %92 = arith.mulf %90, %91 : vector<8x6xf32>
    %93 = math.exp %92 : vector<8x6xf32>
    %94 = vector.extract_strided_slice %93 {offsets = [0, 1], sizes = [8, 5], strides = [1, 1]} : vector<8x6xf32> to vector<8x5xf32>
    %95 = vector.extract_strided_slice %93 {offsets = [0, 0], sizes = [8, 1], strides = [1, 1]} : vector<8x6xf32> to vector<8x1xf32>
    %96 = tpu.concatenate %94, %95 in 1 : vector<8x5xf32>, vector<8x1xf32> -> vector<8x6xf32>
    %97 = vector.extract_strided_slice %93 {offsets = [0, 4], sizes = [8, 2], strides = [1, 1]} : vector<8x6xf32> to vector<8x2xf32>
    %98 = vector.extract_strided_slice %93 {offsets = [0, 0], sizes = [8, 4], strides = [1, 1]} : vector<8x6xf32> to vector<8x4xf32>
    %99 = tpu.concatenate %97, %98 in 1 : vector<8x2xf32>, vector<8x4xf32> -> vector<8x6xf32>
    %c2_i32_20 = arith.constant 2 : i32
    %100 = vector.broadcast %c2_i32_20 : i32 to vector<8x6xi32>
    %101 = arith.cmpi slt, %67, %100 : vector<8x6xi32>
    %102 = arith.select %101, %96, %99 : vector<8x6xi1>, vector<8x6xf32>
    %103 = arith.addf %93, %102 : vector<8x6xf32>
    %104 = vector.extract_strided_slice %93 {offsets = [0, 2], sizes = [8, 4], strides = [1, 1]} : vector<8x6xf32> to vector<8x4xf32>
    %105 = vector.extract_strided_slice %93 {offsets = [0, 0], sizes = [8, 2], strides = [1, 1]} : vector<8x6xf32> to vector<8x2xf32>
    %106 = tpu.concatenate %104, %105 in 1 : vector<8x4xf32>, vector<8x2xf32> -> vector<8x6xf32>
    %107 = vector.extract_strided_slice %93 {offsets = [0, 5], sizes = [8, 1], strides = [1, 1]} : vector<8x6xf32> to vector<8x1xf32>
    %108 = vector.extract_strided_slice %93 {offsets = [0, 0], sizes = [8, 5], strides = [1, 1]} : vector<8x6xf32> to vector<8x5xf32>
    %109 = tpu.concatenate %107, %108 in 1 : vector<8x1xf32>, vector<8x5xf32> -> vector<8x6xf32>
    %c1_i32_21 = arith.constant 1 : i32
    %110 = vector.broadcast %c1_i32_21 : i32 to vector<8x6xi32>
    %111 = arith.cmpi slt, %67, %110 : vector<8x6xi32>
    %112 = arith.select %111, %106, %109 : vector<8x6xi1>, vector<8x6xf32>
    %113 = arith.addf %103, %112 : vector<8x6xf32>
    %114 = arith.divf %93, %113 : vector<8x6xf32>
    %c0_22 = arith.constant 0 : index
    %c0_23 = arith.constant 0 : index
    %115 = vector.load %arg7[%c0_22, %c0_23] : memref<8x6xf32, #tpu.memory_space<vmem>>, vector<8x6xf32>
    tpu.vector_store %arg7[%c0_22, %c0_23], %114 {strides = array<i32>} : memref<8x6xf32, #tpu.memory_space<vmem>>, vector<8x6xf32>,
    return
  }
  func.func @transform_0(%arg0: i32, %arg1: i32) -> i32 {
    %c0_i32 = arith.constant 0 : i32
    %c0_i32_0 = arith.constant 0 : i32
    return %c0_i32 : i32
  }
  func.func @transform_1(%arg0: i32, %arg1: i32) -> i32 {
    %c0_i32 = arith.constant 0 : i32
    %c0_i32_0 = arith.constant 0 : i32
    return %c0_i32 : i32
  }
  func.func @transform_2(%arg0: i32, %arg1: i32) -> (i32, i32) {
    %c0_i32 = arith.constant 0 : i32
    %c0_i32_0 = arith.constant 0 : i32
    return %arg0, %c0_i32 : i32, i32
  }
  func.func @transform_3(%arg0: i32, %arg1: i32) -> (i32, i32) {
    %c0_i32 = arith.constant 0 : i32
    %c0_i32_0 = arith.constant 0 : i32
    return %c0_i32, %arg1 : i32, i32
  }
  func.func @transform_4(%arg0: i32, %arg1: i32) -> (i32, i32) {
    %c0_i32 = arith.constant 0 : i32
    %c0_i32_0 = arith.constant 0 : i32
    return %c0_i32, %arg1 : i32, i32
  }
  func.func @transform_5(%arg0: i32, %arg1: i32) -> (i32, i32) {
    %c0_i32 = arith.constant 0 : i32
    return %arg0, %arg1 : i32, i32
  }
}

</mosaic_0001>

<bundles_post_ra>
// kernel: tpu_custom_call.1
= control target key start
LH: loop header
LB: loop body
LE: loop exit
PB: predicated region body
PF: predicated region fallthrough
CT: control target
= control target key end

     0   :  { %s731_s22 = smov 0   ;;  %s733_s23 = smov 0   ;;  %s823_s0 = inlined_call_operand.<no memory space> [shape: f32[1], index: 0, kind: input, shape index: {}]   ;;  %s824_s1 = inlined_call_operand.<no memory space> [shape: s32[1], index: 1, kind: input, shape index: {}]   ;;  %s825_s2 = inlined_call_operand.vmem [shape: bf16[16,32], index: 2, kind: input, shape index: {}]   ;;  %s826_s3 = inlined_call_operand.vmem [shape: bf16[32,6], index: 3, kind: input, shape index: {}]   ;;  %s827_s4 = inlined_call_operand.vmem [shape: f32[1,6], index: 4, kind: input, shape index: {}]   ;;  %s828_s5 = inlined_call_operand.vmem [shape: f32[16,6], index: 5, kind: output, shape index: {}]  }
   0x1   :  { %10 = sst [smem:[#allocation2]] %s823_s0  ;;  %s735_s24 = smov 0  }
   0x2   :  { %11 = sst [smem:[#allocation3]] %s824_s1 }
   0x3 LB: > { %s29_s0 = sadd.s32 1, %s680_s23  ;;  %p599_p0 = scmp.ge.s32.totalorder %s684_s24, 1  ;;  %s684_s24 = sphi %s735_s24, %s17_s24   ;;  %s680_s23 = sphi %s733_s23, %s830_s23   ;;  %s676_s22 = sphi %s731_s22, %s829_s22  }
   0x4   : > { %p31_p1 = scmp.ge.s32.totalorder %s29_s0, 2  ;;  %p219_p2 = scmp.lt.s32.totalorder %s684_s24, 3 }
   0x6   : > { %s832_s0 = smov (%p31_p1, %s29_s0), 0  ;;  %p220_p3 = pnand %p599_p0, %p219_p2 }
   0x7   : > { %p255_p4 = scmp.lt.s32.totalorder (!%p220_p3), %s676_s22, 1  ;;  %s325_s8 = sld [smem:[#allocation3]] (!%p220_p3) }
   0x8   : > { %223 = sbr.rel (%p220_p3) target bundleno = 455 (0x1c7), region = 40  ;;  %s611_s9 = sshll.u32 (!%p220_p3), %s676_s22, 3 }
   0x9   : > { %s422_s11 = sld [smem:[#allocation2]] (!%p220_p3)  ;;  %s686_s14 = smov (!%p220_p3), 126  }
   0xa   : > { %s687_s15 = smov (!%p220_p3), 124   ;;  %s688_s16 = smov (!%p220_p3), 127  }
   0xb   : > { %s689_s17 = smov (!%p220_p3), 4   ;;  %s690_s18 = smov (!%p220_p3), 2  }
   0xc   : > { %s691_s19 = smov (!%p220_p3), 5   ;;  %s692_s20 = smov (!%p220_p3), 1  }
   0xd   : > { %v615_v0 = vld [vmem:[%s826_s3 + $0x8] sm:$0xff]  ;;  %v614_v1 = vld [vmem:[%s826_s3] sm:$0xff]  ;;  %s755_s28 = scalar_select %p255_p4, %s676_s22, 1  ;;  %vm295_vm0 = vcmask 261120   ;;  %v312_v3 = vlaneseq  ;;  %v317_v5 = vstv %s611_s9  ;;  %v694_v57 = vmov 0  }
   0xe   : > { %305 = vmatpush.bf16.msra.mxu0 %v615_v0  ;;  %s326_s10 = smul.u32 2246822519, %s325_s8  ;;  %v651_v33 = vld [vmem:[%s827_s4] ss:$0 sm:$0xff]  ;;  %s693_s21 = smov 123   ;;  %vm398_vm10 = vcmask 15360  }
   0xf   : > { %s600_s29 = sshll.u32 %s755_s28, 2  ;;  %v313_v4 = vshrl.u32 %v312_v3, 7  ;;  %v761_v7 = vand.u32 127, %v312_v3  ;;  %v423_v29 = vstv %s422_s11  ;;  %vm390_vm11 = vcmask 39936   ;;  %s601_s1 = sshll.u32 %s755_s28, 3 }
  0x10   : > { %s258_s7 = scalar_lea.vmem %s825_s2, %s600_s29  ;;  %v327_v11 = vstv %s326_s10  ;;  %v435_v36 = vand.u32 2147483648, %v423_v29  ;;  %vm429_vm1 = vweird.f32 %v423_v29  ;;  %v433_v39 = vand.u32 2147483647, %v423_v29  ;;  %s272_s27 = scalar_lea.vmem %s828_s5, %s601_s1 }
  0x11   : > { %v274_v2 = vld [vmem:[%s258_s7] sm:$0xf]  ;;  %v318_v6 = vadd.s32 %v317_v5, %v313_v4  ;;  %v352_v48 = vand.u32 65535, %v761_v7  ;;  %v353_v49 = vshrl.u32 %v761_v7, 16  ;;  %vm409_vm13 = vcmask 31744  }
  0x12   : > { %306 = vmatpush.bf16.msra.mxu0 %v614_v1  ;;  %v436_v43 = vor.u32 1.1754944e-38, %v435_v36  ;;  %vm434_vm4 = vcmp.eq.f32.partialorder %v433_v39, 8.507059e+37  ;;  %vm417_vm14 = vcmask 7168  }
  0x13   : > { %v322_v8 = vmul.u32 6, %v318_v6  ;;  %v356_v50 = vmul.u32 43690, %v352_v48  ;;  %v355_v51 = vmul.u32 43691, %v352_v48  ;;  %v357_v52 = vmul.u32 43691, %v353_v49 }
  0x14   : > { %v358_v56 = vmul.u32 43690, %v353_v49 }
  0x15   : > { %610 = vmatmul.msk.bf16.vlgmr.msra.gmra.mxu0 %vm295_vm0, %v274_v2  ;;  %v323_v9 = vadd.s32 %v322_v8, %v761_v7  ;;  %v359_v53 = vshll.u32 %v356_v50, 16  ;;  %v361_v54 = vshll.u32 %v357_v52, 16  ;;  %v360_v61 = vshrl.u32 %v356_v50, 16 }
  0x16   : > { %v362_v63 = vshrl.u32 %v357_v52, 16 }
  0x17   : > { %v324_v10 = vmul.u32 2654435761, %v323_v9  ;;  %vm363_vm5 = vc.u32 %v355_v51, %v359_v53  ;;  %v365_v55 = vadd.s32 %v359_v53, %v355_v51 }
  0x18   : > { %v364_v58 = vsel %vm363_vm5, 1, %v694_v57 }
  0x19   : > { %v328_v12 = vadd.s32 %v327_v11, %v324_v10  ;;  %vm367_vm6 = vc.u32 %v365_v55, %v361_v54  ;;  %v366_v59 = vadd.s32 %v364_v58, %v358_v56 }
  0x1a   : > { %v368_v60 = vsel %vm367_vm6, 1, %v694_v57 }
  0x1b   : > { %v329_v13 = vshrl.u32 %v328_v12, 16  ;;  %v370_v62 = vadd.s32 %v368_v60, %v366_v59 }
  0x1d   : > { %v330_v14 = vxor.u32 %v329_v13, %v328_v12  ;;  %v371_v0 = vadd.s32 %v370_v62, %v360_v61 }
  0x1f   : > { %v331_v15 = vmul.u32 2146121005, %v330_v14  ;;  %v372_v1 = vadd.s32 %v371_v0, %v362_v63 }
  0x21   : > { %v332_v16 = vshrl.u32 %v331_v15, 15  ;;  %v373_v2 = vshrl.u32 %v372_v1, 1 }
  0x23   : > { %v333_v17 = vxor.u32 %v332_v16, %v331_v15  ;;  %v374_v3 = vmul.u32 3, %v373_v2 }
  0x25   : > { %v334_v18 = vmul.u32 2221713035, %v333_v17  ;;  %v375_v4 = vsub.s32 %v761_v7, %v374_v3 }
  0x27   : > { %v335_v19 = vshrl.u32 %v334_v18, 16  ;;  %vm378_vm7 = vcmp.ne.s32.totalorder %v375_v4, 0  ;;  %vm379_vm8 = vcmp.lt.s32.totalorder %v375_v4, 0  ;;  %v381_v9 = vadd.s32 3, %v375_v4 }
  0x28   : > { %vm380_vm9 = vmand %vm379_vm8, %vm378_vm7 }
  0x29   : > { %v336_v20 = vxor.u32 %v335_v19, %v334_v18  ;;  %v382_v11 = vsel %vm380_vm9, %v381_v9, %v375_v4 }
  0x2a   : > { %vm400_vm12 = vcmp.lt.s32.totalorder %v382_v11, 2  ;;  %vm419_vm15 = vcmp.lt.s32.totalorder %v382_v11, 1 }
  0x2b   : > { %v337_v21 = vshrl.u32 %v336_v20, 8 }
  0x2d   : > { %v338_v22 = vcvt.s32.f32 %v337_v21 }
  0x2f   : > { %v339_v23 = vmul.f32 5.9604645e-08, %v338_v22 }
  0x31   : > { %v340_v24 = vadd.f32 1e-20, %v339_v23 }
  0x33   : > { %652 = vlog2.f32 %v340_v24 }
  0x39   : > { %v653_v25 = vpop.eup %652 }
  0x3a   : > { %v342_v26 = vmul.f32 0.6931472, %v653_v25 }
  0x3c   : > { %v343_v27 = vsub.f32 0.0, %v342_v26 }
  0x3e   : > { %v344_v28 = vadd.f32 1e-20, %v343_v27 }
  0x40   : > { %654 = vlog2.f32 %v344_v28 }
  0x41   : > { %656 = vrcp.f32 %v423_v29 }
  0x46   : > { %v655_v30 = vpop.eup %654 }
  0x47   : > { %v346_v31 = vmul.f32 0.6931472, %v655_v30  ;;  %v657_v32 = vpop.eup %656 }
  0x48   : > { %v425_v34 = vmul.f32 %v657_v32, %v423_v29  ;;  %vm430_vm2 = vweird.f32 %v657_v32 }
  0x49   : > { %v347_v35 = vsub.f32 0.0, %v346_v31  ;;  %vm431_vm3 = vmor %vm429_vm1, %vm430_vm2 }
  0x4a   : > { %v426_v38 = vsub.f32 1.0, %v425_v34 }
  0x4c   : > { %v427_v41 = vmul.f32 %v657_v32, %v426_v38 }
  0x4e   : > { %v428_v44 = vadd.f32 %v657_v32, %v427_v41 }
  0x50   : > { %v432_v45 = vsel %vm431_vm3, %v657_v32, %v428_v44 }
  0x51   : > { %v437_v46 = vsel %vm434_vm4, %v436_v43, %v432_v45  ;;  %vm492_vm4 = vcmask 48128  }
  0x52   : > { %616 = vpush %v437_v46 }
  0x83   : > { %s617_s22 = spop %616 }
  0x84   : > { %v440_v23 = vstv %s617_s22 }
  0x92   : > { %v308_v37 = vpop.f32.mrf.mxu0 }
  0x93   : > { %v309_v40 = vadd.f32 %v651_v33, %v308_v37 }
  0x95   : > { %v767_v42 = vadd.f32 %v347_v35, %v309_v40 }
  0x97   : > { %403 = vrot.lane.b32.xlu2 %v767_v42, %s686_s14  ;;  %392 = vrot.lane.b32.xlu1 %v767_v42, %s687_s15 }
  0x98   : > { %384 = vrot.lane.b32.xlu0 %v767_v42, %s688_s16 }
  0x9a   : > { %v310_v47 = vpop.f32.mrf.mxu0 }
  0x9f   : > { %406 = vrot.lane.b32.xlu2 %v767_v42, %s689_s17  ;;  %395 = vrot.lane.b32.xlu1 %v767_v42, %s690_s18 }
  0xa0   : > { %387 = vrot.lane.b32.xlu0 %v767_v42, %s691_s19 }
  0xa7   : > { %414 = vrot.lane.b32.xlu1 %v767_v42, %s692_s20 }
  0xa8   : > { %411 = vrot.lane.b32.xlu0 %v767_v42, %s693_s21 }
  0xf1   : > { %v404_v8 = vpop.permute.xlu2 %403 }
  0xf9   : > { %v407_v15 = vpop.permute.xlu2 %406 }
  0xfa   : > { %v410_v18 = vsel %vm409_vm13, %v404_v8, %v407_v15 }
 0x109   : > { %v393_v5 = vpop.permute.xlu1 %392 }
 0x10a   : > { %v385_v6 = vpop.permute.xlu0 %384 }
 0x111   : > { %v396_v10 = vpop.permute.xlu1 %395 }
 0x112   : > { %v388_v12 = vpop.permute.xlu0 %387  ;;  %v399_v13 = vsel %vm398_vm10, %v393_v5, %v396_v10 }
 0x113   : > { %v391_v14 = vsel %vm390_vm11, %v385_v6, %v388_v12 }
 0x114   : > { %v401_v7 = vsel %vm400_vm12, %v391_v14, %v399_v13 }
 0x115   : > { %v402_v19 = vmax.f32 %v767_v42, %v401_v7 }
 0x119   : > { %v415_v16 = vpop.permute.xlu1 %414 }
 0x11a   : > { %v412_v17 = vpop.permute.xlu0 %411 }
 0x11b   : > { %v418_v20 = vsel %vm417_vm14, %v412_v17, %v415_v16 }
 0x11c   : > { %v420_v21 = vsel %vm419_vm15, %v410_v18, %v418_v20 }
 0x11d   : > { %v421_v22 = vmax.f32 %v402_v19, %v420_v21 }
 0x11f   : > { %v439_v24 = vsub.f32 %v767_v42, %v421_v22 }
 0x121   : > { %v441_v25 = vmul.f32 %v440_v23, %v439_v24 }
 0x123   : > { %v442_v26 = vmul.f32 1.442695, %v441_v25 }
 0x125   : > { %658 = vpow2.f32 %v442_v26 }
 0x12b   : > { %v659_v27 = vpop.eup %658 }
 0x12c   : > { %452 = vrot.lane.b32.xlu1 %v659_v27, %s687_s15  ;;  %448 = vrot.lane.b32.xlu0 %v659_v27, %s691_s19 }
 0x12d   : > { %445 = vrot.lane.b32.xlu2 %v659_v27, %s688_s16 }
 0x134   : > { %464 = vrot.lane.b32.xlu1 %v659_v27, %s689_s17  ;;  %461 = vrot.lane.b32.xlu0 %v659_v27, %s686_s14 }
 0x135   : > { %455 = vrot.lane.b32.xlu2 %v659_v27, %s690_s18 }
 0x13c   : > { %471 = vrot.lane.b32.xlu0 %v659_v27, %s692_s20 }
 0x13d   : > { %468 = vrot.lane.b32.xlu2 %v659_v27, %s693_s21 }
 0x187   : > { %v446_v28 = vpop.permute.xlu2 %445 }
 0x18f   : > { %v456_v31 = vpop.permute.xlu2 %455 }
 0x197   : > { %v469_v37 = vpop.permute.xlu2 %468 }
 0x19e   : > { %v449_v29 = vpop.permute.xlu0 %448  ;;  %v453_v30 = vpop.permute.xlu1 %452 }
 0x19f   : > { %v458_v33 = vsel %vm398_vm10, %v453_v30, %v456_v31  ;;  %v451_v34 = vsel %vm390_vm11, %v446_v28, %v449_v29 }
 0x1a0   : > { %v459_v35 = vsel %vm400_vm12, %v451_v34, %v458_v33 }
 0x1a1   : > { %v460_v39 = vadd.f32 %v659_v27, %v459_v35 }
 0x1a6   : > { %v462_v32 = vpop.permute.xlu0 %461  ;;  %v465_v36 = vpop.permute.xlu1 %464 }
 0x1a7   : > { %v467_v40 = vsel %vm409_vm13, %v462_v32, %v465_v36 }
 0x1ae   : > { %v472_v38 = vpop.permute.xlu0 %471 }
 0x1af   : > { %v474_v41 = vsel %vm417_vm14, %v469_v37, %v472_v38 }
 0x1b0   : > { %v475_v42 = vsel %vm419_vm15, %v467_v40, %v474_v41 }
 0x1b1   : > { %v476_v43 = vadd.f32 %v475_v42, %v460_v39 }
 0x1b3   : > { %660 = vrcp.f32 %v476_v43  ;;  %v488_v47 = vand.u32 2147483648, %v476_v43  ;;  %v486_v49 = vand.u32 2147483647, %v476_v43  ;;  %vm482_vm1 = vweird.f32 %v476_v43 }
 0x1b5   : > { %v489_v51 = vor.u32 1.1754944e-38, %v488_v47  ;;  %vm487_vm3 = vcmp.eq.f32.partialorder %v486_v49, 8.507059e+37 }
 0x1b9   : > { %v661_v44 = vpop.eup %660 }
 0x1ba   : > { %v478_v45 = vmul.f32 %v661_v44, %v476_v43  ;;  %vm483_vm0 = vweird.f32 %v661_v44 }
 0x1bb   : > { %vm484_vm2 = vmor %vm482_vm1, %vm483_vm0 }
 0x1bc   : > { %v479_v46 = vsub.f32 1.0, %v478_v45 }
 0x1be   : > { %v480_v48 = vmul.f32 %v661_v44, %v479_v46 }
 0x1c0   : > { %v481_v50 = vadd.f32 %v661_v44, %v480_v48 }
 0x1c2   : > { %v485_v52 = vsel %vm484_vm2, %v661_v44, %v481_v50 }
 0x1c3   : > { %v490_v53 = vsel %vm487_vm3, %v489_v51, %v485_v52 }
 0x1c4   : > { %v491_v54 = vmul.f32 %v659_v27, %v490_v53 }
 0x1c6   : > { %493 = vst.msk [vmem:[%s272_s27] sm:$0xff] %vm492_vm4, %v491_v54 }
 0x1c7 PF: > { %s17_s24 = sadd.s32 1, %s684_s24   ;;  %s829_s22 = smov %s680_s23 }
 0x1c8   : > { %p14_p5 = scmp.ge.s32.totalorder %s17_s24, 4   ;;  %s830_s23 = smov %s832_s0 }
 0x1ca   :  { %16 = sbr.rel (!%p14_p5) target bundleno = 3 (0x3), region = 76 }

</bundles_post_ra>
